<compile_context>
chip_gen: v7x
topology: tpu7x:2x2x1
jax: 0.10.0
libtpu: 0.0.40
codegen_flags: <defaults>
</compile_context>

<pallas_src>
import functools
import math

import jax
import jax.numpy as jnp
from jax.experimental import pallas as pl
from jax.experimental.pallas import tpu as pltpu

D_MODEL = 128
_MIB = 1 << 20
_VMEM_BUDGET = 40 * _MIB   # per-step live-bytes target (fits v7x's 64 MiB physical)


# ---------------------------------------------------------------------------
# VMEM estimators (per grid step: double-buffered inputs + live temporaries)
# ---------------------------------------------------------------------------
def _single_block_vmem(bb, S, D, in_item):
    x_blk = 2 * bb * S * D * in_item             # x block, 2 pipeline buffers
    ss = bb * S * S
    temps = 2 * ss * 4 + ss * 2                  # scores/e (f32) + bf16 cast of e
    attn = bb * S * D * 4                        # u / attn (f32)
    return x_blk + temps + attn + _MIB


def _flash_vmem(bb, S, tk, D, in_item):
    xq = 2 * bb * S * D * in_item                # query block (resident across k)
    xk = 2 * bb * tk * D * in_item               # key/value block (pipelined)
    acc = bb * S * D * 4 + 2 * bb * S * 4        # acc + m/l scratch (f32)
    st = bb * S * tk
    temps = 2 * st * 4 + st * 2                  # s/e (f32) + bf16 cast of e
    return xq + xk + acc + temps + _MIB


# ---------------------------------------------------------------------------
# Tiling choices
# ---------------------------------------------------------------------------
def _choose_bb(B, S, vmem_fn, target_rows=2048):
    """Batch-block size: big DMAs (~target_rows stacked rows / step), within the
    VMEM budget, divisor of B, and (when B allows) >=2 grid blocks with an even
    grid size so v7x's two TensorCores stay balanced."""
    cap = max(1, target_rows // max(S, 1))
    divisors = [d for d in range(1, B + 1) if B % d == 0]
    fits = [d for d in divisors if d <= cap and vmem_fn(d) <= _VMEM_BUDGET]
    if not fits:
        fits = [1]
    bb = max(fits)
    if B // bb < 2:                               # keep >=2 parallel grid blocks
        cands = [d for d in fits if B // d >= 2]
        if cands:
            bb = max(cands)
    if (B // bb) % 2 and B // bb > 1:             # prefer an even grid (v7x)
        cands = [d for d in fits if (B // d) % 2 == 0 and d >= max(1, bb // 2)]
        if cands:
            bb = max(cands)
    return bb


def _pick_key_block(S, D, in_item):
    """Largest key block (multiple of 16, proper divisor of S, <=1024) whose
    flash-path working set at bb=1 fits the VMEM budget."""
    cands = [t for t in range(16, min(S - 1, 1024) + 1, 16)
             if S % t == 0 and _flash_vmem(1, S, t, D, in_item) <= _VMEM_BUDGET]
    return max(cands) if cands else None


# ---------------------------------------------------------------------------
# Kernels
# ---------------------------------------------------------------------------
def _pool_and_store(attn, watt_ref, o_ref, approx_reciprocal, flat_out):
    """Attention pooling over the sequence axis; writes the (bb, D) result.

    NOTE: the Linear bias b_att is deliberately dropped — it adds a constant
    along the softmax axis, which is an EXACT no-op (shift invariance).
    """
    w = watt_ref[0].astype(jnp.float32)                        # (D,)
    ps = jnp.sum(attn * w, axis=-1, keepdims=True)             # (bb, S, 1)
    ps = ps - jnp.max(ps, axis=1, keepdims=True)
    pe = jnp.exp(ps)
    pw = pe * pl.reciprocal(jnp.sum(pe, axis=1, keepdims=True),
                            approx=approx_reciprocal)          # (bb, S, 1)
    o_ref[...] = jnp.sum(attn * pw, axis=1, keepdims=not flat_out)


def _fuser_v3_kernel(x_ref, watt_ref, o_ref, *, matmul_dtype, approx_reciprocal,
                     flat_out):
    # Single-block path: whole (S, S) score tile fits in VMEM.
    x = x_ref[...]                                             # (bb, S, D), matmul dtype
    inv_sqrt_d = 1.0 / math.sqrt(float(x.shape[-1]))

    # ScaledDotAttention(x, x, x) with deferred softmax normalization:
    #   e = exp(x x^T / sqrt(D) - rowmax);  attn = (e @ x) * (1 / rowsum(e))
    scores = jnp.einsum("bqd,bkd->bqk", x, x,
                        preferred_element_type=jnp.float32) * inv_sqrt_d
    scores = scores - jnp.max(scores, axis=-1, keepdims=True)
    e = jnp.exp(scores)                                        # (bb,S,S) f32 in (0,1]
    l = jnp.sum(e, axis=-1, keepdims=True)                     # (bb,S,1)
    u = jnp.einsum("bqk,bkd->bqd", e.astype(matmul_dtype), x,
                   preferred_element_type=jnp.float32)         # (bb,S,D) f32
    attn = u * pl.reciprocal(l, approx=approx_reciprocal)

    _pool_and_store(attn, watt_ref, o_ref, approx_reciprocal, flat_out)


def _fuser_v3_flash_kernel(xq_ref, xk_ref, watt_ref, o_ref, m_sc, l_sc, acc_sc, *,
                           matmul_dtype, approx_reciprocal, flat_out):
    # Key-blocked (flash) path: online softmax over the key grid axis.
    k = pl.program_id(1)

    @pl.when(k == 0)
    def _():
        m_sc[...] = jnp.full_like(m_sc, -jnp.inf)
        l_sc[...] = jnp.zeros_like(l_sc)
        acc_sc[...] = jnp.zeros_like(acc_sc)

    xq = xq_ref[...]                                           # (bb, S, D)
    xk = xk_ref[...]                                           # (bb, tk, D)
    inv_sqrt_d = 1.0 / math.sqrt(float(xq.shape[-1]))

    s = jnp.einsum("bqd,bkd->bqk", xq, xk,
                   preferred_element_type=jnp.float32) * inv_sqrt_d
    m_new = jnp.maximum(m_sc[...], jnp.max(s, axis=-1, keepdims=True))
    a = jnp.exp(m_sc[...] - m_new)
    e = jnp.exp(s - m_new)                                     # (bb, S, tk) f32
    l_sc[...] = a * l_sc[...] + jnp.sum(e, axis=-1, keepdims=True)
    acc_sc[...] = a * acc_sc[...] + jnp.einsum(
        "bqk,bkd->bqd", e.astype(matmul_dtype), xk,
        preferred_element_type=jnp.float32)
    m_sc[...] = m_new

    @pl.when(k == pl.num_programs(1) - 1)
    def _():
        attn = acc_sc[...] * pl.reciprocal(l_sc[...], approx=approx_reciprocal)
        _pool_and_store(attn, watt_ref, o_ref, approx_reciprocal, flat_out)


# ---------------------------------------------------------------------------
# Wrapper
# ---------------------------------------------------------------------------
def fuser_v3(x, params, *, matmul_dtype=jnp.bfloat16, approx_reciprocal=True,
             block_b=None, key_block=None):
    """x: (B, S, D) f32 -> (B, D) f32."""
    B, S, D = x.shape
    watt, _batt = params                 # b_att unused in-kernel (shift invariance)
    watt = watt.astype(jnp.float32)

    in_dtype = jnp.dtype(matmul_dtype)
    x_in = x.astype(in_dtype)            # cast in the wrapper: bf16 halves HBM traffic
    in_item = in_dtype.itemsize

    # ---- path selection: single-block vs key-blocked (flash) -------------
    if key_block is None and _single_block_vmem(1, S, D, in_item) > _VMEM_BUDGET:
        key_block = _pick_key_block(S, D, in_item)
    use_flash = key_block is not None and key_block < S
    if use_flash:
        assert S % key_block == 0 and key_block % 16 == 0, (S, key_block)

    vmem_fn = ((lambda bb: _flash_vmem(bb, S, key_block, D, in_item)) if use_flash
               else (lambda bb: _single_block_vmem(bb, S, D, in_item)))
    bb = _choose_bb(B, S, vmem_fn) if block_b is None else block_b
    assert B % bb == 0, (B, bb)

    flat_out = (bb % 8 == 0)             # (bb,128) full-tile stores when possible
    out_shape = (jax.ShapeDtypeStruct((B, D), jnp.float32) if flat_out
                 else jax.ShapeDtypeStruct((B, 1, D), jnp.float32))
    vmem_limit = int(min(max(vmem_fn(bb) * 5 // 4, 32 * _MIB), 60 * _MIB))

    if use_flash:
        kernel = functools.partial(_fuser_v3_flash_kernel,
                                   matmul_dtype=matmul_dtype,
                                   approx_reciprocal=approx_reciprocal,
                                   flat_out=flat_out)
        out_specs = (pl.BlockSpec((bb, D), lambda b, k: (b, 0)) if flat_out
                     else pl.BlockSpec((bb, 1, D), lambda b, k: (b, 0, 0)))
        out = pl.pallas_call(
            kernel,
            out_shape=out_shape,
            grid_spec=pltpu.PrefetchScalarGridSpec(
                num_scalar_prefetch=0,
                grid=(B // bb, S // key_block),
                in_specs=[
                    pl.BlockSpec((bb, S, D), lambda b, k: (b, 0, 0)),          # queries
                    pl.BlockSpec((bb, key_block, D), lambda b, k: (b, k, 0)),  # keys/vals
                    pl.BlockSpec((1, D), lambda b, k: (0, 0)),                 # w_att
                ],
                out_specs=out_specs,
                scratch_shapes=[
                    pltpu.VMEM((bb, S, 1), jnp.float32),   # running max
                    pltpu.VMEM((bb, S, 1), jnp.float32),   # running sum
                    pltpu.VMEM((bb, S, D), jnp.float32),   # unnormalized PV accumulator
                ],
            ),
            compiler_params=pltpu.CompilerParams(
                dimension_semantics=("parallel", "arbitrary"),
                vmem_limit_bytes=vmem_limit),
        )(x_in, x_in, watt)
    else:
        kernel = functools.partial(_fuser_v3_kernel,
                                   matmul_dtype=matmul_dtype,
                                   approx_reciprocal=approx_reciprocal,
                                   flat_out=flat_out)
        out_specs = (pl.BlockSpec((bb, D), lambda b: (b, 0)) if flat_out
                     else pl.BlockSpec((bb, 1, D), lambda b: (b, 0, 0)))
        out = pl.pallas_call(
            kernel,
            out_shape=out_shape,
            grid_spec=pltpu.PrefetchScalarGridSpec(
                num_scalar_prefetch=0,
                grid=(B // bb,),
                in_specs=[
                    pl.BlockSpec((bb, S, D), lambda b: (b, 0, 0)),  # x (batch-blocked)
                    pl.BlockSpec((1, D), lambda b: (0, 0)),         # w_att (resident)
                ],
                out_specs=out_specs,
            ),
            compiler_params=pltpu.CompilerParams(
                dimension_semantics=("parallel",),
                vmem_limit_bytes=vmem_limit),
        )(x_in, watt)

    return out if flat_out else out.reshape(B, D)


# ---------------------------------------------------------------------------
# Params / reference
# ---------------------------------------------------------------------------
def init_params(key, d_model=D_MODEL):
    """PyTorch-Linear-style init for Attention.lin (weight (1,D), bias (1,))."""
    k1, k2 = jax.random.split(key)
    bound = 1.0 / math.sqrt(d_model)
    watt = jax.random.uniform(k1, (1, d_model), jnp.float32, -bound, bound)
    batt = jax.random.uniform(k2, (1,), jnp.float32, -bound, bound)
    return (watt, batt)


def fuser_v3_reference(x, params):
    """Pure-JAX reference mirroring the PyTorch forward exactly (incl. bias)."""
    watt, batt = params
    d = x.shape[-1]
    scores = jnp.einsum("bqd,bkd->bqk", x, x) / math.sqrt(d)
    w = jax.nn.softmax(scores, axis=-1)
    attn = jnp.einsum("bqk,bkd->bqd", w, x)
    pscores = jnp.einsum("bsd,od->bso", attn, watt) + batt        # (B, S, 1)
    pw = jax.nn.softmax(pscores, axis=-2)
    return jnp.sum(attn * pw, axis=-2)                            # (B, D)


if __name__ == "__main__":
    key = jax.random.PRNGKey(0)
    kx, kp, kx2 = jax.random.split(key, 3)
    D = D_MODEL
    params = init_params(kp, D)

    # --- small shape, single-block path -----------------------------------
    B, S = 2, 8
    x = jax.random.normal(kx, (B, S, D), jnp.float32)
    ref = fuser_v3_reference(x, params)

    out_f32 = jax.block_until_ready(
        fuser_v3(x, params, matmul_dtype=jnp.float32, approx_reciprocal=False))
    assert out_f32.shape == (B, D)
    assert jnp.allclose(out_f32, ref, atol=1e-3, rtol=1e-3), \
        "f32 single-block kernel mismatch vs reference"

    out_fast = jax.block_until_ready(fuser_v3(x, params))
    assert out_fast.shape == (B, D)
    assert jnp.allclose(out_fast, ref, atol=1e-1, rtol=1e-1), \
        "bf16 single-block kernel mismatch vs reference"

    # --- exercise the key-blocked (flash) path at a small size ------------
    B2, S2 = 4, 32
    x2 = jax.random.normal(kx2, (B2, S2, D), jnp.float32)
    ref2 = fuser_v3_reference(x2, params)

    out_flash = jax.block_until_ready(
        fuser_v3(x2, params, matmul_dtype=jnp.float32, approx_reciprocal=False,
                 key_block=16))
    assert out_flash.shape == (B2, D)
    assert jnp.allclose(out_flash, ref2, atol=1e-3, rtol=1e-3), \
        "f32 flash kernel mismatch vs reference"

    out_flash_fast = jax.block_until_ready(fuser_v3(x2, params, key_block=16))
    assert out_flash_fast.shape == (B2, D)
    assert jnp.allclose(out_flash_fast, ref2, atol=1e-1, rtol=1e-1), \
        "bf16 flash kernel mismatch vs reference"

    print("KERNEL_OK")
</pallas_src>

<mosaic_0001>
module attributes {stable_mosaic.version = 11 : i64} {
  func.func @_fuser_v3_kernel(%arg0: i32, %arg1: memref<1x8x128xf32, #tpu.memory_space<vmem>>, %arg2: memref<1x128xf32, #tpu.memory_space<vmem>>, %arg3: memref<1x1x128xf32, #tpu.memory_space<vmem>>) attributes {dimension_semantics = [#tpu.dimension_semantics<parallel>], iteration_bounds = array<i64: 2>, scalar_prefetch = 0 : i64, scratch_operands = 0 : i64, tpu.core_type = #tpu.core_type<tc>, window_params = [{transform_indices = @transform_0, window_bounds = array<i64: 1, 8, 128>}, {pipeline_mode = #tpu.pipeline_mode<synchronous>, transform_indices = @transform_1, window_bounds = array<i64: 1, 128>}, {transform_indices = @transform_2, window_bounds = array<i64: 1, 1, 128>}]} {
    %c0 = arith.constant 0 : index
    %c0_0 = arith.constant 0 : index
    %c0_1 = arith.constant 0 : index
    %0 = vector.load %arg1[%c0, %c0_0, %c0_1] : memref<1x8x128xf32, #tpu.memory_space<vmem>>, vector<1x8x128xf32>
    "tpu.trace_start"() <{level = 10 : i32, message = "bqd,bkd->bqk"}> : () -> ()
    %cst = arith.constant dense<0.000000e+00> : vector<1x8x8xf32>
    %1 = tpu.matmul %0, %0, %cst {dimension_numbers = #tpu.dot_dimension_numbers<[2], [2], [1], [1], [0, 0, 0, 1, 1, 1], [0], [0]>} : vector<1x8x128xf32>, vector<1x8x128xf32>, vector<1x8x8xf32> -> vector<1x8x8xf32>
    "tpu.trace_stop"() : () -> ()
    %cst_2 = arith.constant 0.0883883461 : f32
    %2 = vector.broadcast %cst_2 : f32 to vector<1x8x8xf32>
    %3 = arith.mulf %1, %2 : vector<1x8x8xf32>
    %cst_3 = arith.constant dense<0xFF800000> : vector<1x8xf32>
    %4 = vector.multi_reduction <maximumf>, %3, %cst_3 [2] : vector<1x8x8xf32> to vector<1x8xf32>
    %5 = vector.shape_cast %4 : vector<1x8xf32> to vector<1x8x1xf32>
    %6 = vector.broadcast %5 : vector<1x8x1xf32> to vector<1x8x8xf32>
    %7 = arith.subf %3, %6 : vector<1x8x8xf32>
    %8 = math.exp %7 : vector<1x8x8xf32>
    %cst_4 = arith.constant dense<0.000000e+00> : vector<1x8xf32>
    %9 = vector.multi_reduction <add>, %8, %cst_4 [2] : vector<1x8x8xf32> to vector<1x8xf32>
    %10 = vector.shape_cast %9 : vector<1x8xf32> to vector<1x8x1xf32>
    "tpu.trace_start"() <{level = 10 : i32, message = "bqk,bkd->bqd"}> : () -> ()
    %cst_5 = arith.constant dense<0.000000e+00> : vector<1x8x128xf32>
    %11 = tpu.matmul %8, %0, %cst_5 {dimension_numbers = #tpu.dot_dimension_numbers<[2], [1], [1], [2], [0, 0, 0, 1, 1, 2], [0], [0]>} : vector<1x8x8xf32>, vector<1x8x128xf32>, vector<1x8x128xf32> -> vector<1x8x128xf32>
    "tpu.trace_stop"() : () -> ()
    %12 = tpu.reciprocal %10 : vector<1x8x1xf32> -> vector<1x8x1xf32>
    %13 = vector.broadcast %12 : vector<1x8x1xf32> to vector<1x8x128xf32>
    %14 = arith.mulf %11, %13 : vector<1x8x128xf32>
    %c0_6 = arith.constant 0 : index
    %c0_7 = arith.constant 0 : index
    %15 = vector.load %arg2[%c0_6, %c0_7] : memref<1x128xf32, #tpu.memory_space<vmem>>, vector<1x128xf32>
    %16 = vector.shape_cast %15 : vector<1x128xf32> to vector<128xf32>
    %17 = vector.shape_cast %16 : vector<128xf32> to vector<1x1x128xf32>
    %18 = vector.broadcast %17 : vector<1x1x128xf32> to vector<1x8x128xf32>
    %19 = arith.mulf %14, %18 : vector<1x8x128xf32>
    %cst_8 = arith.constant dense<0.000000e+00> : vector<1x8xf32>
    %20 = vector.multi_reduction <add>, %19, %cst_8 [2] : vector<1x8x128xf32> to vector<1x8xf32>
    %21 = vector.shape_cast %20 : vector<1x8xf32> to vector<1x8x1xf32>
    %cst_9 = arith.constant dense<0xFF800000> : vector<1x1xf32>
    %22 = vector.multi_reduction <maximumf>, %21, %cst_9 [1] : vector<1x8x1xf32> to vector<1x1xf32>
    %23 = vector.shape_cast %22 : vector<1x1xf32> to vector<1x1x1xf32>
    %24 = vector.broadcast %23 : vector<1x1x1xf32> to vector<1x8x1xf32>
    %25 = arith.subf %21, %24 : vector<1x8x1xf32>
    %26 = math.exp %25 : vector<1x8x1xf32>
    %cst_10 = arith.constant dense<0.000000e+00> : vector<1x1xf32>
    %27 = vector.multi_reduction <add>, %26, %cst_10 [1] : vector<1x8x1xf32> to vector<1x1xf32>
    %28 = vector.shape_cast %27 : vector<1x1xf32> to vector<1x1x1xf32>
    %29 = tpu.reciprocal %28 : vector<1x1x1xf32> -> vector<1x1x1xf32>
    %30 = vector.broadcast %29 : vector<1x1x1xf32> to vector<1x8x1xf32>
    %31 = arith.mulf %26, %30 : vector<1x8x1xf32>
    %32 = vector.broadcast %31 : vector<1x8x1xf32> to vector<1x8x128xf32>
    %33 = arith.mulf %14, %32 : vector<1x8x128xf32>
    %cst_11 = arith.constant dense<0.000000e+00> : vector<1x128xf32>
    %34 = vector.multi_reduction <add>, %33, %cst_11 [1] : vector<1x8x128xf32> to vector<1x128xf32>
    %35 = vector.shape_cast %34 : vector<1x128xf32> to vector<1x1x128xf32>
    %c0_12 = arith.constant 0 : index
    %c0_13 = arith.constant 0 : index
    %c0_14 = arith.constant 0 : index
    %36 = vector.load %arg3[%c0_12, %c0_13, %c0_14] : memref<1x1x128xf32, #tpu.memory_space<vmem>>, vector<1x1x128xf32>
    tpu.vector_store %arg3[%c0_12, %c0_13, %c0_14], %35 {strides = array<i32>} : memref<1x1x128xf32, #tpu.memory_space<vmem>>, vector<1x1x128xf32>,
    return
  }
  func.func @transform_0(%arg0: i32) -> (i32, i32, i32) {
    %c0_i32 = arith.constant 0 : i32
    %c0_i32_0 = arith.constant 0 : i32
    %c0_i32_1 = arith.constant 0 : i32
    return %arg0, %c0_i32, %c0_i32_0 : i32, i32, i32
  }
  func.func @transform_1(%arg0: i32) -> (i32, i32) {
    %c0_i32 = arith.constant 0 : i32
    %c0_i32_0 = arith.constant 0 : i32
    %c0_i32_1 = arith.constant 0 : i32
    return %c0_i32, %c0_i32_0 : i32, i32
  }
  func.func @transform_2(%arg0: i32) -> (i32, i32, i32) {
    %c0_i32 = arith.constant 0 : i32
    %c0_i32_0 = arith.constant 0 : i32
    %c0_i32_1 = arith.constant 0 : i32
    return %arg0, %c0_i32, %c0_i32_0 : i32, i32, i32
  }
}

</mosaic_0001>

<bundles_post_ra>
// kernel: tpu_custom_call.1
= control target key start
LH: loop header
LB: loop body
LE: loop exit
PB: predicated region body
PF: predicated region fallthrough
CT: control target
= control target key end

     0   :  { %7 = vsyncpa [#allocation3], 0  ;;  %s793_s0 = inlined_call_operand.hbm [shape: f32[2,8,128], index: 0, kind: input, shape index: {}]   ;;  %s794_s1 = inlined_call_operand.vmem [shape: f32[1,128], index: 1, kind: input, shape index: {}]   ;;  %s795_s2 = inlined_call_operand.hbm [shape: f32[2,1,128], index: 2, kind: output, shape index: {}]  }
   0x1   :  { %9 = vsyncpa [#allocation3 + $0x1], 0 }
   0x2   :  { %10 = vsyncpa [#allocation4], 0 }
   0x3   :  { %12 = vsyncpa [#allocation4 + $0x1], 0  ;;  %s628_s9 = smov 0   ;;  %s630_s10 = smov 0  }
   0x4   :  { %s632_s11 = smov 0   ;;  %s634_s12 = smov 0  }
   0x5 LB: > { %s649_s13 = sadd.s32 4294967295, %s607_s12   ;;  %s429_s14 = sadd.s32 4294967294, %s607_s12   ;;  %s607_s12 = sphi %s634_s12, %s810_s12   ;;  %s603_s11 = sphi %s632_s11, %s809_s11   ;;  %s599_s10 = sphi %s630_s10, %s808_s10   ;;  %s595_s9 = sphi %s628_s9, %s807_s9  }
   0x6   : > { %s653_s15 = sadd.s32 1, %s607_s12   ;;  %s25_s16 = sadd.s32 1, %s603_s11 }
   0x7   : > { %s22_s17 = ssub.s32 %s607_s12, %s653_s15  ;;  %p32_p0 = scmp.ne.s32.totalorder %s603_s11, %s599_s10 }
   0x8   : > { %p23_p1 = scmp.eq.s32.totalorder %s22_s17, 0  ;;  %p33_p2 = scmp.eq.s32.totalorder %s607_s12, 0 }
   0x9   : > { %p38_p3 = scmp.ne.s32.totalorder %s599_s10, %s595_s9  ;;  %p39_p4 = scmp.eq.s32.totalorder %s649_s13, 0 }
   0xa   : > { %s665_s18 = scalar_select %p23_p1, %s603_s11, %s25_s16  }
   0xb   : > { %p667_p5 = por %p33_p2, %p32_p0  ;;  %p671_p6 = por %p39_p4, %p38_p3 }
   0xc   : > { %p83_p7 = scmp.eq.s32.totalorder %s649_s13, 1  ;;  %p89_p8 = scmp.eq.s32.totalorder %s429_s14, 1 }
   0xd   : > { %p467_p10 = scmp.lt.s32.totalorder %s607_s12, 2  ;;  %s112_s23 = sand.u32 1, %s603_s11  }
   0xe   : > { %p678_p11 = por %p83_p7, %p32_p0  ;;  %p682_p12 = por %p89_p8, %p38_p3 }
   0xf   : > { %s433_s24 = sshll.u32 %s607_s12, 7  ;;  %s432_s25 = sshll.u32 %s112_s23, 3 }
  0x10   : > { %s799_s21 = scalar_select %p678_p11, 1, 0 }
  0x11   : > { %s800_s22 = scalar_select %p682_p12, 1, 0 }
  0x12   : > { %s691_s28 = scalar_lea.hbm %s793_s0, %s433_s24  ;;  %s116_s29 = scalar_lea.vmem [#allocation2], %s432_s25 }
  0x13   : > { %s123_s30 = sshll.u32 %s116_s29, 4  ;;  %p695_p13 = pnand %p467_p10, %p667_p5  ;;  %s699_s30 = int_to_ptr.vmem [resolvable:$true] %s123_s30 }
  0x14   : > { %s113_s4 = scalar_lea.sflag [#allocation3], %s112_s23  ;;  %s511_s5 = scalar_lea.hbm %s691_s28, 128 }
  0x15   : > { %p512_p2 = scmp.ne.s32.totalorder %s691_s28, %s511_s5  ;;  %p513_p3 = pneg %p695_p13 }
  0x16   : > { %s516_s8 = scalar_lea.hbm %s793_s0, 256  ;;  %p517_p5 = scmp.lt.u32.totalorder %s691_s28, %s793_s0 }
  0x17   : > { %p514_p4 = pnand %p513_p3, %p512_p2  ;;  %p518_p8 = scmp.lt.u32.totalorder %s516_s8, %s511_s5 }
  0x18   : > { %p520_p9 = scmp.lt.u32.totalorder %s511_s5, %s691_s28 }
  0x19   : > { %p515_p7 = pneg %p514_p4  ;;  %p519_p10 = por %p518_p8, %p517_p5 }
  0x1b   : > { %p521_p0 = por %p520_p9, %p519_p10 }
  0x1d   : > { %p522_p1 = pnand %p521_p0, %p515_p7 }
  0x1f   : > { %525 = shalt.err (!%p522_p1)
}
  0x20   : > { %s526_s17 = scalar_lea.vmem %s699_s30, 128  ;;  %s609_s19 = smov [#allocation2]  }
  0x21   : > { %p527_p2 = scmp.ne.s32.totalorder %s699_s30, %s526_s17  ;;  %s531_s23 = sshll.u32 %s609_s19, 4  ;;  %s532_s23 = int_to_ptr.vmem [resolvable:$false] %s531_s23 }
  0x22   : > { %s533_s24 = scalar_lea.vmem %s532_s23, 256  ;;  %p534_p11 = scmp.lt.s32.totalorder %s699_s30, %s532_s23 }
  0x23   : > { %p529_p4 = pnand %p527_p2, %p513_p3  ;;  %p535_p5 = scmp.lt.s32.totalorder %s533_s24, %s526_s17 }
  0x25   : > { %p530_p12 = pneg %p529_p4  ;;  %p536_p8 = por %p535_p5, %p534_p11 }
  0x27   : > { %p537_p9 = pnand %p536_p8, %p530_p12 }
  0x29   : > { %540 = shalt.err (!%p537_p9)
}
  0x2a   : > { %462 = dma.hbm_to_vmem [thread:$0]  (!%p695_p13), %s691_s28, 128, %s699_s30, %s113_s4  }
  0x2b   : > { %p802_p0 = scmp.lt.s32.totalorder %s607_s12, 3  ;;  %p803_p1 = scmp.ge.s32.totalorder %s607_s12, 1 }
  0x2d   : > { %p129_p3 = pnand %p803_p1, %p802_p0 }
  0x2e   : > { %s733_s25 = sand.u32 (!%p129_p3), 1, %s599_s10  }
  0x2f   : > { %132 = sbr.rel (%p129_p3) target bundleno = 871 (0x367), region = 28  ;;  %s435_s26 = sshll.u32 (!%p129_p3), %s733_s25, 3 }
  0x30   : > { %s135_s27 = scalar_lea.sflag (!%p129_p3), [#allocation3], %s733_s25  ;;  %s138_s29 = scalar_lea.vmem (!%p129_p3), [#allocation2], %s435_s26 }
  0x36   : > { %586 = dma.done.wait (%p671_p6), %s135_s27, 128  }
  0x37   : > { %588 = vsyncadd (%p671_p6), %s135_s27, 4294967168  ;;  %v610_v0 = vmov 0.0   ;;  %vm611_vm0 = vmmov 0   ;;  %v158_v1 = vld [vmem:[%s138_s29] sm:$0xff]  ;;  %vm230_vm1 = vcmask 64512   ;;  %s438_s30 = sshll.u32 %s649_s13, 4 }
  0x38   : > { %445 = vmatprep.subr.mxu0 %v610_v0  ;;  %447 = vmatprep.mubr.msk.f32.mxu0 %vm611_vm0, %v610_v0  ;;  %v437_v14 = vld [vmem:[%s794_s1] ss:$0 sm:$0xff]  ;;  %s157_s3 = scalar_lea.vmem [#allocation5], %s733_s25  ;;  %s749_s7 = scalar_lea.hbm %s795_s2, %s438_s30 }
  0x39   : > { %450 = vmatprep.subr.mxu1 %v610_v0  ;;  %452 = vmatprep.mubr.msk.f32.mxu1 %vm611_vm0, %v610_v0  ;;  %s363_s4 = sshll.u32 %s157_s3, 4  ;;  %s351_s8 = scalar_lea.sflag [#allocation4], %s733_s25  ;;  %s751_s4 = int_to_ptr.vmem [resolvable:$true] %s363_s4 }
  0x3a   : > { %446 = vmatpush3.xpose.msra.mxu0 %v158_v1  ;;  %451 = vmatpush3.msra.mxu1 %v158_v1  ;;  %s541_s14 = scalar_lea.vmem %s751_s4, 16  ;;  %p804_p11 = scmp.ne.s32.totalorder %s799_s21, 0 }
  0x3b   : > { %p542_p6 = scmp.ne.s32.totalorder %s751_s4, %s541_s14  ;;  %s612_s13 = smov [#allocation5]  }
  0x3c   : > { %s545_s16 = sshll.u32 %s612_s13, 4  ;;  %s546_s16 = int_to_ptr.vmem [resolvable:$false] %s545_s16 }
  0x3d   : > { %448 = vmatmul.mubr.f32.vlgmr.msra.gmra.mrb[0].mxu0 %v158_v1  ;;  %p543_p12 = pnand %p542_p6, %p804_p11  ;;  %s547_s17 = scalar_lea.vmem %s546_s16, 32 }
  0x3e   : > { %p548_p7 = scmp.lt.s32.totalorder %s751_s4, %s546_s16  ;;  %p549_p10 = scmp.lt.s32.totalorder %s547_s17, %s541_s14 }
  0x3f   : > { %p544_p13 = pneg %p543_p12 }
  0x40   : > { %p550_p2 = por %p549_p10, %p548_p7 }
  0x42   : > { %p551_p4 = pnand %p550_p2, %p544_p13 }
 0x110   : > { %v225_v2 = vpop.f32.mrb[0].mxu0 }
 0x111   : > { %v229_v3 = vmul.f32 0.088388346, %v225_v2  ;;  %v449_v4 = vpop.f32.mrb[1].mxu0 }
 0x113   : > { %v231_v5 = vsel %vm230_vm1, %v229_v3, -inf }
 0x114   : > { %232 = vmax.xlane.f32.xlu0 %v231_v5 }
 0x1a1   : > { %v233_v6 = vpop.xlane.xlu0 %232 }
 0x1a2   : > { %v234_v7 = vsub.f32 %v229_v3, %v233_v6 }
 0x1a4   : > { %v235_v8 = vmul.f32 1.442695, %v234_v7 }
 0x1a6   : > { %503 = vpow2.f32 %v235_v8 }
 0x1b0   : > { %v504_v9 = vpop.eup %503 }
 0x1b1   : > { %453 = vmatmul.mubr.msk.f32.vlgmr.msra.gmra.mrb[0].mxu1 %vm230_vm1, %v504_v9  ;;  %v237_v10 = vsel %vm230_vm1, %v504_v9, 0.0 }
 0x1b2   : > { %238 = vadd.xlane.f32.xlu0 %v237_v10 }
 0x23f   : > { %v239_v11 = vpop.xlane.xlu0 %238 }
 0x240   : > { %505 = vrcp.f32 %v239_v11 }
 0x24a   : > { %v506_v12 = vpop.eup %505 }
 0x284   : > { %v309_v13 = vpop.f32.mrb[0].mxu1 }
 0x285   : > { %v314_v15 = vmul.f32 %v506_v12, %v309_v13  ;;  %v454_v16 = vpop.f32.mrb[1].mxu1 }
 0x287   : > { %v322_v17 = vmul.f32 %v437_v14, %v314_v15 }
 0x289   : > { %323 = vadd.xlane.f32.xlu1 %v322_v17 }
 0x316   : > { %v324_v18 = vpop.xlane.xlu1 %323 }
 0x317   : > { %v325_v19 = vrot.slane %v324_v18, 4 }
 0x319   : > { %v326_v20 = vmax.f32 %v324_v18, %v325_v19 }
 0x31b   : > { %v327_v21 = vrot.slane %v326_v20, 2 }
 0x31d   : > { %v328_v22 = vmax.f32 %v326_v20, %v327_v21 }
 0x31f   : > { %v329_v23 = vrot.slane %v328_v22, 1 }
 0x321   : > { %v330_v24 = vmax.f32 %v328_v22, %v329_v23 }
 0x323   : > { %v331_v25 = vsub.f32 %v324_v18, %v330_v24 }
 0x325   : > { %v332_v26 = vmul.f32 1.442695, %v331_v25 }
 0x327   : > { %507 = vpow2.f32 %v332_v26 }
 0x331   : > { %v508_v27 = vpop.eup %507 }
 0x332   : > { %v334_v28 = vrot.slane %v508_v27, 4 }
 0x334   : > { %v335_v29 = vadd.f32 %v508_v27, %v334_v28 }
 0x336   : > { %v336_v30 = vrot.slane %v335_v29, 2 }
 0x338   : > { %v337_v31 = vadd.f32 %v336_v30, %v335_v29 }
 0x33a   : > { %v338_v32 = vrot.slane %v337_v31, 1 }
 0x33c   : > { %v339_v33 = vadd.f32 %v338_v32, %v337_v31 }
 0x33e   : > { %509 = vrcp.f32 %v339_v33 }
 0x348   : > { %v510_v34 = vpop.eup %509 }
 0x349   : > { %v341_v35 = vmul.f32 %v510_v34, %v508_v27 }
 0x34b   : > { %v342_v36 = vmul.f32 %v341_v35, %v314_v15 }
 0x34d   : > { %v343_v37 = vrot.slane %v342_v36, 4 }
 0x34f   : > { %v344_v38 = vadd.f32 %v343_v37, %v342_v36 }
 0x351   : > { %v345_v39 = vrot.slane %v344_v38, 2 }
 0x353   : > { %v346_v40 = vadd.f32 %v345_v39, %v344_v38 }
 0x355   : > { %v347_v41 = vrot.slane %v346_v40, 1 }
 0x357   : > { %v348_v42 = vadd.f32 %v347_v41, %v346_v40 }
 0x359   : > { %349 = vst [vmem:[%s157_s3] sm:$0x1] %v348_v42 }
 0x35a   : > { %554 = shalt.err (!%p551_p4)
}
 0x35b   : > { %s555_s19 = scalar_lea.hbm %s749_s7, 16  ;;  %s559_s25 = scalar_lea.hbm %s795_s2, 32 }
 0x35c   : > { %p556_p5 = scmp.ne.s32.totalorder %s749_s7, %s555_s19  ;;  %p560_p0 = scmp.lt.u32.totalorder %s749_s7, %s795_s2 }
 0x35d   : > { %p561_p1 = scmp.lt.u32.totalorder %s559_s25, %s555_s19  ;;  %p563_p6 = scmp.lt.u32.totalorder %s555_s19, %s749_s7 }
 0x35e   : > { %p557_p8 = pnand %p556_p5, %p804_p11 }
 0x35f   : > { %p562_p3 = por %p561_p1, %p560_p0 }
 0x360   : > { %p558_p9 = pneg %p557_p8 }
 0x361   : > { %p564_p12 = por %p563_p6, %p562_p3 }
 0x363   : > { %p565_p13 = pnand %p564_p12, %p558_p9 }
 0x365   : > { %568 = shalt.err (!%p565_p13)
}
 0x366   : > { %457 = dma.vmem_to_hbm [thread:$0]  (%p804_p11), %s751_s4, 16, %s749_s7, %s351_s8  }
 0x367 PF: > { %s375_s29 = sand.u32 1, %s595_s9   ;;  %p805_p7 = scmp.ne.s32.totalorder %s800_s22, 0 }
 0x368   : > { %p806_p10 = scmp.ge.s32.totalorder %s607_s12, 2  ;;  %s376_s20 = scalar_lea.sflag [#allocation4], %s375_s29 }
 0x36a   : > { %p464_p2 = pnand %p806_p10, %p805_p7 }
 0x36c   : > { %590 = dma.done.wait (!%p464_p2), %s376_s20, 16  }
 0x36d   : > { %592 = vsyncadd (!%p464_p2), %s376_s20, 4294967280  ;;  %p15_p4 = scmp.ge.s32.totalorder %s653_s15, 4   ;;  %s807_s9 = smov %s599_s10 }
 0x36e   : > { %s808_s10 = smov %s603_s11  ;;  %s809_s11 = smov %s665_s18 }
 0x36f   : > { %s810_s12 = smov %s653_s15  ;;  %17 = sbr.rel (!%p15_p4) target bundleno = 5 (0x5), region = 73 }
 0x376   :  { %380 = vsyncpa [#allocation3], 1 }
 0x377   :  { %382 = vsyncpa [#allocation3 + $0x1], 1 }
 0x378   :  { %383 = vsyncpa [#allocation4], 1 }
 0x379   :  { %385 = vsyncpa [#allocation4 + $0x1], 1 }

</bundles_post_ra>
